<compile_context>
chip_gen: v5e
topology: v5e:2x2
jax: 0.10.0
libtpu: 0.0.40
codegen_flags: <defaults>
</compile_context>

<pallas_src>
import functools
import math

import jax
import jax.numpy as jnp
from jax import lax
from jax.experimental import pallas as pl
from jax.experimental.pallas import tpu as pltpu


# Fully unroll the time loop up to this many steps; beyond that use
# lax.fori_loop with a small unroll window (a serial chain gains nothing from
# unrolling past a few steps, it only inflates code size and vreg pressure).
_UNROLL_LIMIT = 64


def _pick_unroll(n, cap=8):
    """Largest unroll factor <= cap that divides n (keeps scan unrolling trivial)."""
    for u in (8, 4, 2):
        if u <= cap and n >= u and n % u == 0:
            return u
    return 1


def _activation(x):
    # Assumed Tanh_shifted_and_scaled (see TODO above).
    return 0.5 * (jnp.tanh(x) + 1.0)


def _srnn_kernel(patterns_ref, jt_ref, wout_ref, out_ref, w_ref, hist_ref, *,
                 dt, on_time, scale):
    """All-in-VMEM recurrent simulation.

    patterns_ref: (P, N)     input patterns (P-major)
    jt_ref:       (N, N)     J^T (recurrent weights, transposed)
    wout_ref:     (1, N)     readout weights
    out_ref:      (1, T*P)   readout, column index = t*P + p (wrapper reshapes)
    w_ref:        (N, N)     VMEM scratch: prescaled bf16 weights 0.5*dt*J^T
    hist_ref:     (T*P, N)   VMEM scratch: tanh(x) history
    """
    Pn, N = patterns_ref.shape
    TP = hist_ref.shape[0]
    T = TP // Pn
    t_on = min(on_time, T)

    # ---- one-time prescaling (off the per-step critical path) -------------
    # r @ (dt*J^T) = tanh(x) @ (0.5*dt*J^T) + 0.5*dt*(1 @ J^T)
    w_ref[...] = (0.5 * dt * jt_ref[...]).astype(jnp.bfloat16)
    bias = 0.5 * dt * jnp.sum(jt_ref[...], axis=0, keepdims=True)     # (1, N)
    bias_off = jnp.broadcast_to(bias, (Pn, N))       # hoisted broadcast (1 vreg)
    bias_on = bias_off + dt * patterns_ref[...]      # + dt*input while t < ON_time
    one_minus_dt = 1.0 - dt

    x0 = jnp.zeros((Pn, N), jnp.float32)
    th0 = jnp.tanh(x0).astype(jnp.bfloat16)          # tanh(0)

    def step(x, th_bf, bias_eff, row_start):
        # Hot path: bf16 MXU matmul with f32 accumulation.
        z = jnp.dot(th_bf, w_ref[...], preferred_element_type=jnp.float32)
        # (1-dt)*x is independent of the matmul result -> overlaps with the MXU.
        x = one_minus_dt * x + (z + bias_eff)
        th = jnp.tanh(x)
        # Store tanh history (vst slot; nothing reads it until after the loop,
        # so it is off the dependency chain).
        hist_ref[pl.ds(row_start, Pn), :] = th
        return x, th.astype(jnp.bfloat16)

    if T <= _UNROLL_LIMIT:
        # Fully unrolled and split at ON_time: no per-step select or broadcast.
        x, th = x0, th0
        for t in range(t_on):
            x, th = step(x, th, bias_on, t * Pn)
        for t in range(t_on, T):
            x, th = step(x, th, bias_off, t * Pn)
    else:
        # Long simulations: two fori_loop regions with a small unroll window.
        def body_on(t, carry):
            x, th = carry
            return step(x, th, bias_on, pl.multiple_of(t * Pn, Pn))

        def body_off(t, carry):
            x, th = carry
            return step(x, th, bias_off, pl.multiple_of(t * Pn, Pn))

        carry = (x0, th0)
        if t_on > 0:
            carry = lax.fori_loop(0, t_on, body_on, carry,
                                  unroll=_pick_unroll(t_on))
        if T > t_on:
            carry = lax.fori_loop(t_on, T, body_off, carry,
                                  unroll=_pick_unroll(T - t_on))
        x, th = carry

    # ---- deferred, lane-dense readout --------------------------------------
    # readout[t*P+p] = scale * sum_j r[p,j]*wout[j]
    #               = sum_j tanh(x)[p,j]*(0.5*scale*wout[j]) + 0.5*scale*sum(wout)
    wout_eff = (0.5 * scale) * wout_ref[...]                          # (1, N)
    const = (0.5 * scale) * jnp.sum(wout_ref[...])
    hist = hist_ref[...]                                              # (T*P, N)
    out = lax.dot_general(wout_eff, hist,
                          dimension_numbers=(((1,), (1,)), ((), ())),
                          preferred_element_type=jnp.float32)         # (1, T*P)
    out_ref[...] = out + const


def srnn_forward(patterns_pn, j_mat, wout, *, n_time_steps, dt, on_time,
                 f_in, f_out):
    """Pallas implementation of SRNN.forward(N_time_steps). Returns (P, T)."""
    P, N = patterns_pn.shape
    assert P % 8 == 0, "P must be a multiple of 8 (f32 sublane tiling)"
    scale = 1.0 / (f_in * f_out * N)
    tp = n_time_steps * P
    kernel = functools.partial(_srnn_kernel, dt=dt, on_time=on_time, scale=scale)
    out_flat = pl.pallas_call(
        kernel,
        out_shape=jax.ShapeDtypeStruct((1, tp), jnp.float32),
        in_specs=[
            pl.BlockSpec((P, N), lambda: (0, 0)),
            pl.BlockSpec((N, N), lambda: (0, 0)),
            pl.BlockSpec((1, N), lambda: (0, 0)),
        ],
        out_specs=pl.BlockSpec((1, tp), lambda: (0, 0)),
        scratch_shapes=[
            pltpu.VMEM((N, N), jnp.bfloat16),       # prescaled 0.5*dt*J^T
            pltpu.VMEM((tp, N), jnp.float32),       # tanh(x) history
        ],
        compiler_params=pltpu.CompilerParams(vmem_limit_bytes=32 * 1024 * 1024),
    )(patterns_pn, j_mat.T, wout)
    # columns are time-major / pattern-minor -> (T, P) -> (P, T) like torch `readout`
    return out_flat.reshape(n_time_steps, P).T


def srnn_reference(patterns_pn, j_mat, wout, *, n_time_steps, dt, on_time,
                   f_in, f_out):
    """Pure-JAX reference mirroring the PyTorch forward loop (f32, HIGHEST)."""
    P, N = patterns_pn.shape
    jt = j_mat.T
    x = jnp.zeros((P, N), jnp.float32)
    r = _activation(x)
    cols = []
    for t in range(n_time_steps):
        inp = patterns_pn if t < on_time else jnp.zeros_like(patterns_pn)
        x = x + dt * (-x + jnp.dot(r, jt, precision=lax.Precision.HIGHEST) + inp)
        r = _activation(x)
        cols.append(jnp.sum(r * wout, axis=1))
    out = jnp.stack(cols, axis=1)  # (P, T)
    return out / (f_in * f_out * N)


def init_srnn_params(key, *, N, P, f, f_out):
    """Deterministic synthetic params mirroring init_network/init_params
    (J_init_type='covariance', f_in=1, learn_readout=False)."""
    k1, k2, k3, k4 = jax.random.split(key, 4)

    # patterns ~ U(-1, 1), shape (N, P)  (torch stores N-major; kernel uses P-major)
    patterns_np = jax.random.uniform(k1, (N, P), jnp.float32, -1.0, 1.0)
    labels = (2 * jax.random.randint(k2, (1, P), 0, 2) - 1).astype(jnp.float32)

    g = 10.0 * 0.1 ** 0.25 / math.sqrt(N * P * math.sqrt(f))

    # 'covariance' init, then sparsify: keep fraction f of entries (SparseLinear).
    temp_j = g * ((patterns_np * labels) @ patterns_np.T)  # (N, N)
    n_keep = int(N * N * f)
    keep_flat = jax.random.permutation(k3, N * N)[:n_keep]
    mask = jnp.zeros((N * N,), jnp.float32).at[keep_flat].set(1.0).reshape(N, N)
    j_mat = temp_j * mask

    # w_out: sparse (1, N) with int(N * f_out) ones at random positions (not trained).
    n_out = int(N * f_out)
    out_ids = jax.random.permutation(k4, N)[:n_out]
    wout = jnp.zeros((1, N), jnp.float32).at[0, out_ids].set(1.0)

    patterns_pn = patterns_np.T  # (P, N) layout for the kernel
    return patterns_pn, j_mat, wout


if __name__ == "__main__":
    # Small, module-consistent sizes.
    N = 128          # init_info['N']
    P = 8            # input_info['P'] (explicit, small)
    ON_TIME = 4      # input_info['ON_time']
    DT = 0.1         # init_info['dt']
    F = 0.05         # init_info['f']
    F_IN = 1.0       # input_info['f_in']
    F_OUT = 0.1      # output_info['f_out']

    key = jax.random.PRNGKey(0)
    patterns_pn, j_mat, wout = init_srnn_params(key, N=N, P=P, f=F, f_out=F_OUT)

    # Exercise both time-loop code paths: fully unrolled (T=16) and
    # fori_loop with bounded unroll (T=80 > _UNROLL_LIMIT).
    for T in (16, 80):
        kw = dict(n_time_steps=T, dt=DT, on_time=ON_TIME, f_in=F_IN, f_out=F_OUT)

        readout = srnn_forward(patterns_pn, j_mat, wout, **kw)
        readout = jax.block_until_ready(readout)
        assert readout.shape == (P, T), readout.shape

        ref_fn = jax.jit(functools.partial(srnn_reference, **kw))
        ref = jax.block_until_ready(ref_fn(patterns_pn, j_mat, wout))

        assert jnp.allclose(readout, ref, rtol=2e-2, atol=2e-2), (
            T, float(jnp.max(jnp.abs(readout - ref)))
        )

    print("KERNEL_OK")
</pallas_src>

<mosaic_0001>
module attributes {stable_mosaic.version = 11 : i64} {
  func.func @_srnn_kernel(%arg0: memref<8x128xf32, #tpu.memory_space<vmem>>, %arg1: memref<128x128xf32, #tpu.memory_space<vmem>>, %arg2: memref<1x128xf32, #tpu.memory_space<vmem>>, %arg3: memref<1x128xf32, #tpu.memory_space<vmem>>, %arg4: memref<128x128xbf16, #tpu.memory_space<vmem>>, %arg5: memref<128x128xf32, #tpu.memory_space<vmem>>) attributes {dimension_semantics = [], scalar_prefetch = 0 : i64, scratch_operands = 2 : i64, tpu.core_type = #tpu.core_type<tc>} {
    %c0 = arith.constant 0 : index
    %c0_0 = arith.constant 0 : index
    %0 = vector.load %arg1[%c0, %c0_0] : memref<128x128xf32, #tpu.memory_space<vmem>>, vector<128x128xf32>
    %cst = arith.constant 5.000000e-02 : f32
    %1 = vector.broadcast %cst : f32 to vector<128x128xf32>
    %2 = arith.mulf %1, %0 : vector<128x128xf32>
    %3 = arith.truncf %2 : vector<128x128xf32> to vector<128x128xbf16>
    %c0_1 = arith.constant 0 : index
    %c0_2 = arith.constant 0 : index
    %4 = vector.load %arg4[%c0_1, %c0_2] : memref<128x128xbf16, #tpu.memory_space<vmem>>, vector<128x128xbf16>
    tpu.vector_store %arg4[%c0_1, %c0_2], %3 {strides = array<i32>} : memref<128x128xbf16, #tpu.memory_space<vmem>>, vector<128x128xbf16>,
    %c0_3 = arith.constant 0 : index
    %c0_4 = arith.constant 0 : index
    %5 = vector.load %arg1[%c0_3, %c0_4] : memref<128x128xf32, #tpu.memory_space<vmem>>, vector<128x128xf32>
    %cst_5 = arith.constant dense<0.000000e+00> : vector<128xf32>
    %6 = vector.multi_reduction <add>, %5, %cst_5 [0] : vector<128x128xf32> to vector<128xf32>
    %7 = vector.shape_cast %6 : vector<128xf32> to vector<1x128xf32>
    %cst_6 = arith.constant 5.000000e-02 : f32
    %8 = vector.broadcast %cst_6 : f32 to vector<1x128xf32>
    %9 = arith.mulf %8, %7 : vector<1x128xf32>
    %10 = vector.shape_cast %9 : vector<1x128xf32> to vector<1x128xf32>
    %11 = vector.broadcast %10 : vector<1x128xf32> to vector<8x128xf32>
    %c0_7 = arith.constant 0 : index
    %c0_8 = arith.constant 0 : index
    %12 = vector.load %arg0[%c0_7, %c0_8] : memref<8x128xf32, #tpu.memory_space<vmem>>, vector<8x128xf32>
    %cst_9 = arith.constant 1.000000e-01 : f32
    %13 = vector.broadcast %cst_9 : f32 to vector<8x128xf32>
    %14 = arith.mulf %13, %12 : vector<8x128xf32>
    %15 = arith.addf %11, %14 : vector<8x128xf32>
    %cst_10 = arith.constant 0.000000e+00 : f32
    %16 = vector.broadcast %cst_10 : f32 to vector<8x128xf32>
    %17 = math.tanh %16 : vector<8x128xf32>
    %18 = arith.truncf %17 : vector<8x128xf32> to vector<8x128xbf16>
    %c0_11 = arith.constant 0 : index
    %c0_12 = arith.constant 0 : index
    %19 = vector.load %arg4[%c0_11, %c0_12] : memref<128x128xbf16, #tpu.memory_space<vmem>>, vector<128x128xbf16>
    %cst_13 = arith.constant dense<0.000000e+00> : vector<8x128xf32>
    %20 = tpu.matmul %18, %19, %cst_13 {dimension_numbers = #tpu.dot_dimension_numbers<[1], [0], [0], [1], [0, 0, 1, 1], [], []>} : vector<8x128xbf16>, vector<128x128xbf16>, vector<8x128xf32> -> vector<8x128xf32>
    %cst_14 = arith.constant 0.899999976 : f32
    %21 = vector.broadcast %cst_14 : f32 to vector<8x128xf32>
    %22 = arith.mulf %21, %16 : vector<8x128xf32>
    %23 = arith.addf %20, %15 : vector<8x128xf32>
    %24 = arith.addf %22, %23 : vector<8x128xf32>
    %25 = math.tanh %24 : vector<8x128xf32>
    %c0_15 = arith.constant 0 : index
    %c0_16 = arith.constant 0 : index
    %26 = vector.load %arg5[%c0_15, %c0_16] : memref<128x128xf32, #tpu.memory_space<vmem>>, vector<8x128xf32>
    tpu.vector_store %arg5[%c0_15, %c0_16], %25 {strides = array<i32>} : memref<128x128xf32, #tpu.memory_space<vmem>>, vector<8x128xf32>,
    %27 = arith.truncf %25 : vector<8x128xf32> to vector<8x128xbf16>
    %c0_17 = arith.constant 0 : index
    %c0_18 = arith.constant 0 : index
    %28 = vector.load %arg4[%c0_17, %c0_18] : memref<128x128xbf16, #tpu.memory_space<vmem>>, vector<128x128xbf16>
    %cst_19 = arith.constant dense<0.000000e+00> : vector<8x128xf32>
    %29 = tpu.matmul %27, %28, %cst_19 {dimension_numbers = #tpu.dot_dimension_numbers<[1], [0], [0], [1], [0, 0, 1, 1], [], []>} : vector<8x128xbf16>, vector<128x128xbf16>, vector<8x128xf32> -> vector<8x128xf32>
    %cst_20 = arith.constant 0.899999976 : f32
    %30 = vector.broadcast %cst_20 : f32 to vector<8x128xf32>
    %31 = arith.mulf %30, %24 : vector<8x128xf32>
    %32 = arith.addf %29, %15 : vector<8x128xf32>
    %33 = arith.addf %31, %32 : vector<8x128xf32>
    %34 = math.tanh %33 : vector<8x128xf32>
    %c8 = arith.constant 8 : index
    %c0_21 = arith.constant 0 : index
    %35 = vector.load %arg5[%c8, %c0_21] : memref<128x128xf32, #tpu.memory_space<vmem>>, vector<8x128xf32>
    tpu.vector_store %arg5[%c8, %c0_21], %34 {strides = array<i32>} : memref<128x128xf32, #tpu.memory_space<vmem>>, vector<8x128xf32>,
    %36 = arith.truncf %34 : vector<8x128xf32> to vector<8x128xbf16>
    %c0_22 = arith.constant 0 : index
    %c0_23 = arith.constant 0 : index
    %37 = vector.load %arg4[%c0_22, %c0_23] : memref<128x128xbf16, #tpu.memory_space<vmem>>, vector<128x128xbf16>
    %cst_24 = arith.constant dense<0.000000e+00> : vector<8x128xf32>
    %38 = tpu.matmul %36, %37, %cst_24 {dimension_numbers = #tpu.dot_dimension_numbers<[1], [0], [0], [1], [0, 0, 1, 1], [], []>} : vector<8x128xbf16>, vector<128x128xbf16>, vector<8x128xf32> -> vector<8x128xf32>
    %cst_25 = arith.constant 0.899999976 : f32
    %39 = vector.broadcast %cst_25 : f32 to vector<8x128xf32>
    %40 = arith.mulf %39, %33 : vector<8x128xf32>
    %41 = arith.addf %38, %15 : vector<8x128xf32>
    %42 = arith.addf %40, %41 : vector<8x128xf32>
    %43 = math.tanh %42 : vector<8x128xf32>
    %c16 = arith.constant 16 : index
    %c0_26 = arith.constant 0 : index
    %44 = vector.load %arg5[%c16, %c0_26] : memref<128x128xf32, #tpu.memory_space<vmem>>, vector<8x128xf32>
    tpu.vector_store %arg5[%c16, %c0_26], %43 {strides = array<i32>} : memref<128x128xf32, #tpu.memory_space<vmem>>, vector<8x128xf32>,
    %45 = arith.truncf %43 : vector<8x128xf32> to vector<8x128xbf16>
    %c0_27 = arith.constant 0 : index
    %c0_28 = arith.constant 0 : index
    %46 = vector.load %arg4[%c0_27, %c0_28] : memref<128x128xbf16, #tpu.memory_space<vmem>>, vector<128x128xbf16>
    %cst_29 = arith.constant dense<0.000000e+00> : vector<8x128xf32>
    %47 = tpu.matmul %45, %46, %cst_29 {dimension_numbers = #tpu.dot_dimension_numbers<[1], [0], [0], [1], [0, 0, 1, 1], [], []>} : vector<8x128xbf16>, vector<128x128xbf16>, vector<8x128xf32> -> vector<8x128xf32>
    %cst_30 = arith.constant 0.899999976 : f32
    %48 = vector.broadcast %cst_30 : f32 to vector<8x128xf32>
    %49 = arith.mulf %48, %42 : vector<8x128xf32>
    %50 = arith.addf %47, %15 : vector<8x128xf32>
    %51 = arith.addf %49, %50 : vector<8x128xf32>
    %52 = math.tanh %51 : vector<8x128xf32>
    %c24 = arith.constant 24 : index
    %c0_31 = arith.constant 0 : index
    %53 = vector.load %arg5[%c24, %c0_31] : memref<128x128xf32, #tpu.memory_space<vmem>>, vector<8x128xf32>
    tpu.vector_store %arg5[%c24, %c0_31], %52 {strides = array<i32>} : memref<128x128xf32, #tpu.memory_space<vmem>>, vector<8x128xf32>,
    %54 = arith.truncf %52 : vector<8x128xf32> to vector<8x128xbf16>
    %c0_32 = arith.constant 0 : index
    %c0_33 = arith.constant 0 : index
    %55 = vector.load %arg4[%c0_32, %c0_33] : memref<128x128xbf16, #tpu.memory_space<vmem>>, vector<128x128xbf16>
    %cst_34 = arith.constant dense<0.000000e+00> : vector<8x128xf32>
    %56 = tpu.matmul %54, %55, %cst_34 {dimension_numbers = #tpu.dot_dimension_numbers<[1], [0], [0], [1], [0, 0, 1, 1], [], []>} : vector<8x128xbf16>, vector<128x128xbf16>, vector<8x128xf32> -> vector<8x128xf32>
    %cst_35 = arith.constant 0.899999976 : f32
    %57 = vector.broadcast %cst_35 : f32 to vector<8x128xf32>
    %58 = arith.mulf %57, %51 : vector<8x128xf32>
    %59 = arith.addf %56, %11 : vector<8x128xf32>
    %60 = arith.addf %58, %59 : vector<8x128xf32>
    %61 = math.tanh %60 : vector<8x128xf32>
    %c32 = arith.constant 32 : index
    %c0_36 = arith.constant 0 : index
    %62 = vector.load %arg5[%c32, %c0_36] : memref<128x128xf32, #tpu.memory_space<vmem>>, vector<8x128xf32>
    tpu.vector_store %arg5[%c32, %c0_36], %61 {strides = array<i32>} : memref<128x128xf32, #tpu.memory_space<vmem>>, vector<8x128xf32>,
    %63 = arith.truncf %61 : vector<8x128xf32> to vector<8x128xbf16>
    %c0_37 = arith.constant 0 : index
    %c0_38 = arith.constant 0 : index
    %64 = vector.load %arg4[%c0_37, %c0_38] : memref<128x128xbf16, #tpu.memory_space<vmem>>, vector<128x128xbf16>
    %cst_39 = arith.constant dense<0.000000e+00> : vector<8x128xf32>
    %65 = tpu.matmul %63, %64, %cst_39 {dimension_numbers = #tpu.dot_dimension_numbers<[1], [0], [0], [1], [0, 0, 1, 1], [], []>} : vector<8x128xbf16>, vector<128x128xbf16>, vector<8x128xf32> -> vector<8x128xf32>
    %cst_40 = arith.constant 0.899999976 : f32
    %66 = vector.broadcast %cst_40 : f32 to vector<8x128xf32>
    %67 = arith.mulf %66, %60 : vector<8x128xf32>
    %68 = arith.addf %65, %11 : vector<8x128xf32>
    %69 = arith.addf %67, %68 : vector<8x128xf32>
    %70 = math.tanh %69 : vector<8x128xf32>
    %c40 = arith.constant 40 : index
    %c0_41 = arith.constant 0 : index
    %71 = vector.load %arg5[%c40, %c0_41] : memref<128x128xf32, #tpu.memory_space<vmem>>, vector<8x128xf32>
    tpu.vector_store %arg5[%c40, %c0_41], %70 {strides = array<i32>} : memref<128x128xf32, #tpu.memory_space<vmem>>, vector<8x128xf32>,
    %72 = arith.truncf %70 : vector<8x128xf32> to vector<8x128xbf16>
    %c0_42 = arith.constant 0 : index
    %c0_43 = arith.constant 0 : index
    %73 = vector.load %arg4[%c0_42, %c0_43] : memref<128x128xbf16, #tpu.memory_space<vmem>>, vector<128x128xbf16>
    %cst_44 = arith.constant dense<0.000000e+00> : vector<8x128xf32>
    %74 = tpu.matmul %72, %73, %cst_44 {dimension_numbers = #tpu.dot_dimension_numbers<[1], [0], [0], [1], [0, 0, 1, 1], [], []>} : vector<8x128xbf16>, vector<128x128xbf16>, vector<8x128xf32> -> vector<8x128xf32>
    %cst_45 = arith.constant 0.899999976 : f32
    %75 = vector.broadcast %cst_45 : f32 to vector<8x128xf32>
    %76 = arith.mulf %75, %69 : vector<8x128xf32>
    %77 = arith.addf %74, %11 : vector<8x128xf32>
    %78 = arith.addf %76, %77 : vector<8x128xf32>
    %79 = math.tanh %78 : vector<8x128xf32>
    %c48 = arith.constant 48 : index
    %c0_46 = arith.constant 0 : index
    %80 = vector.load %arg5[%c48, %c0_46] : memref<128x128xf32, #tpu.memory_space<vmem>>, vector<8x128xf32>
    tpu.vector_store %arg5[%c48, %c0_46], %79 {strides = array<i32>} : memref<128x128xf32, #tpu.memory_space<vmem>>, vector<8x128xf32>,
    %81 = arith.truncf %79 : vector<8x128xf32> to vector<8x128xbf16>
    %c0_47 = arith.constant 0 : index
    %c0_48 = arith.constant 0 : index
    %82 = vector.load %arg4[%c0_47, %c0_48] : memref<128x128xbf16, #tpu.memory_space<vmem>>, vector<128x128xbf16>
    %cst_49 = arith.constant dense<0.000000e+00> : vector<8x128xf32>
    %83 = tpu.matmul %81, %82, %cst_49 {dimension_numbers = #tpu.dot_dimension_numbers<[1], [0], [0], [1], [0, 0, 1, 1], [], []>} : vector<8x128xbf16>, vector<128x128xbf16>, vector<8x128xf32> -> vector<8x128xf32>
    %cst_50 = arith.constant 0.899999976 : f32
    %84 = vector.broadcast %cst_50 : f32 to vector<8x128xf32>
    %85 = arith.mulf %84, %78 : vector<8x128xf32>
    %86 = arith.addf %83, %11 : vector<8x128xf32>
    %87 = arith.addf %85, %86 : vector<8x128xf32>
    %88 = math.tanh %87 : vector<8x128xf32>
    %c56 = arith.constant 56 : index
    %c0_51 = arith.constant 0 : index
    %89 = vector.load %arg5[%c56, %c0_51] : memref<128x128xf32, #tpu.memory_space<vmem>>, vector<8x128xf32>
    tpu.vector_store %arg5[%c56, %c0_51], %88 {strides = array<i32>} : memref<128x128xf32, #tpu.memory_space<vmem>>, vector<8x128xf32>,
    %90 = arith.truncf %88 : vector<8x128xf32> to vector<8x128xbf16>
    %c0_52 = arith.constant 0 : index
    %c0_53 = arith.constant 0 : index
    %91 = vector.load %arg4[%c0_52, %c0_53] : memref<128x128xbf16, #tpu.memory_space<vmem>>, vector<128x128xbf16>
    %cst_54 = arith.constant dense<0.000000e+00> : vector<8x128xf32>
    %92 = tpu.matmul %90, %91, %cst_54 {dimension_numbers = #tpu.dot_dimension_numbers<[1], [0], [0], [1], [0, 0, 1, 1], [], []>} : vector<8x128xbf16>, vector<128x128xbf16>, vector<8x128xf32> -> vector<8x128xf32>
    %cst_55 = arith.constant 0.899999976 : f32
    %93 = vector.broadcast %cst_55 : f32 to vector<8x128xf32>
    %94 = arith.mulf %93, %87 : vector<8x128xf32>
    %95 = arith.addf %92, %11 : vector<8x128xf32>
    %96 = arith.addf %94, %95 : vector<8x128xf32>
    %97 = math.tanh %96 : vector<8x128xf32>
    %c64 = arith.constant 64 : index
    %c0_56 = arith.constant 0 : index
    %98 = vector.load %arg5[%c64, %c0_56] : memref<128x128xf32, #tpu.memory_space<vmem>>, vector<8x128xf32>
    tpu.vector_store %arg5[%c64, %c0_56], %97 {strides = array<i32>} : memref<128x128xf32, #tpu.memory_space<vmem>>, vector<8x128xf32>,
    %99 = arith.truncf %97 : vector<8x128xf32> to vector<8x128xbf16>
    %c0_57 = arith.constant 0 : index
    %c0_58 = arith.constant 0 : index
    %100 = vector.load %arg4[%c0_57, %c0_58] : memref<128x128xbf16, #tpu.memory_space<vmem>>, vector<128x128xbf16>
    %cst_59 = arith.constant dense<0.000000e+00> : vector<8x128xf32>
    %101 = tpu.matmul %99, %100, %cst_59 {dimension_numbers = #tpu.dot_dimension_numbers<[1], [0], [0], [1], [0, 0, 1, 1], [], []>} : vector<8x128xbf16>, vector<128x128xbf16>, vector<8x128xf32> -> vector<8x128xf32>
    %cst_60 = arith.constant 0.899999976 : f32
    %102 = vector.broadcast %cst_60 : f32 to vector<8x128xf32>
    %103 = arith.mulf %102, %96 : vector<8x128xf32>
    %104 = arith.addf %101, %11 : vector<8x128xf32>
    %105 = arith.addf %103, %104 : vector<8x128xf32>
    %106 = math.tanh %105 : vector<8x128xf32>
    %c72 = arith.constant 72 : index
    %c0_61 = arith.constant 0 : index
    %107 = vector.load %arg5[%c72, %c0_61] : memref<128x128xf32, #tpu.memory_space<vmem>>, vector<8x128xf32>
    tpu.vector_store %arg5[%c72, %c0_61], %106 {strides = array<i32>} : memref<128x128xf32, #tpu.memory_space<vmem>>, vector<8x128xf32>,
    %108 = arith.truncf %106 : vector<8x128xf32> to vector<8x128xbf16>
    %c0_62 = arith.constant 0 : index
    %c0_63 = arith.constant 0 : index
    %109 = vector.load %arg4[%c0_62, %c0_63] : memref<128x128xbf16, #tpu.memory_space<vmem>>, vector<128x128xbf16>
    %cst_64 = arith.constant dense<0.000000e+00> : vector<8x128xf32>
    %110 = tpu.matmul %108, %109, %cst_64 {dimension_numbers = #tpu.dot_dimension_numbers<[1], [0], [0], [1], [0, 0, 1, 1], [], []>} : vector<8x128xbf16>, vector<128x128xbf16>, vector<8x128xf32> -> vector<8x128xf32>
    %cst_65 = arith.constant 0.899999976 : f32
    %111 = vector.broadcast %cst_65 : f32 to vector<8x128xf32>
    %112 = arith.mulf %111, %105 : vector<8x128xf32>
    %113 = arith.addf %110, %11 : vector<8x128xf32>
    %114 = arith.addf %112, %113 : vector<8x128xf32>
    %115 = math.tanh %114 : vector<8x128xf32>
    %c80 = arith.constant 80 : index
    %c0_66 = arith.constant 0 : index
    %116 = vector.load %arg5[%c80, %c0_66] : memref<128x128xf32, #tpu.memory_space<vmem>>, vector<8x128xf32>
    tpu.vector_store %arg5[%c80, %c0_66], %115 {strides = array<i32>} : memref<128x128xf32, #tpu.memory_space<vmem>>, vector<8x128xf32>,
    %117 = arith.truncf %115 : vector<8x128xf32> to vector<8x128xbf16>
    %c0_67 = arith.constant 0 : index
    %c0_68 = arith.constant 0 : index
    %118 = vector.load %arg4[%c0_67, %c0_68] : memref<128x128xbf16, #tpu.memory_space<vmem>>, vector<128x128xbf16>
    %cst_69 = arith.constant dense<0.000000e+00> : vector<8x128xf32>
    %119 = tpu.matmul %117, %118, %cst_69 {dimension_numbers = #tpu.dot_dimension_numbers<[1], [0], [0], [1], [0, 0, 1, 1], [], []>} : vector<8x128xbf16>, vector<128x128xbf16>, vector<8x128xf32> -> vector<8x128xf32>
    %cst_70 = arith.constant 0.899999976 : f32
    %120 = vector.broadcast %cst_70 : f32 to vector<8x128xf32>
    %121 = arith.mulf %120, %114 : vector<8x128xf32>
    %122 = arith.addf %119, %11 : vector<8x128xf32>
    %123 = arith.addf %121, %122 : vector<8x128xf32>
    %124 = math.tanh %123 : vector<8x128xf32>
    %c88 = arith.constant 88 : index
    %c0_71 = arith.constant 0 : index
    %125 = vector.load %arg5[%c88, %c0_71] : memref<128x128xf32, #tpu.memory_space<vmem>>, vector<8x128xf32>
    tpu.vector_store %arg5[%c88, %c0_71], %124 {strides = array<i32>} : memref<128x128xf32, #tpu.memory_space<vmem>>, vector<8x128xf32>,
    %126 = arith.truncf %124 : vector<8x128xf32> to vector<8x128xbf16>
    %c0_72 = arith.constant 0 : index
    %c0_73 = arith.constant 0 : index
    %127 = vector.load %arg4[%c0_72, %c0_73] : memref<128x128xbf16, #tpu.memory_space<vmem>>, vector<128x128xbf16>
    %cst_74 = arith.constant dense<0.000000e+00> : vector<8x128xf32>
    %128 = tpu.matmul %126, %127, %cst_74 {dimension_numbers = #tpu.dot_dimension_numbers<[1], [0], [0], [1], [0, 0, 1, 1], [], []>} : vector<8x128xbf16>, vector<128x128xbf16>, vector<8x128xf32> -> vector<8x128xf32>
    %cst_75 = arith.constant 0.899999976 : f32
    %129 = vector.broadcast %cst_75 : f32 to vector<8x128xf32>
    %130 = arith.mulf %129, %123 : vector<8x128xf32>
    %131 = arith.addf %128, %11 : vector<8x128xf32>
    %132 = arith.addf %130, %131 : vector<8x128xf32>
    %133 = math.tanh %132 : vector<8x128xf32>
    %c96 = arith.constant 96 : index
    %c0_76 = arith.constant 0 : index
    %134 = vector.load %arg5[%c96, %c0_76] : memref<128x128xf32, #tpu.memory_space<vmem>>, vector<8x128xf32>
    tpu.vector_store %arg5[%c96, %c0_76], %133 {strides = array<i32>} : memref<128x128xf32, #tpu.memory_space<vmem>>, vector<8x128xf32>,
    %135 = arith.truncf %133 : vector<8x128xf32> to vector<8x128xbf16>
    %c0_77 = arith.constant 0 : index
    %c0_78 = arith.constant 0 : index
    %136 = vector.load %arg4[%c0_77, %c0_78] : memref<128x128xbf16, #tpu.memory_space<vmem>>, vector<128x128xbf16>
    %cst_79 = arith.constant dense<0.000000e+00> : vector<8x128xf32>
    %137 = tpu.matmul %135, %136, %cst_79 {dimension_numbers = #tpu.dot_dimension_numbers<[1], [0], [0], [1], [0, 0, 1, 1], [], []>} : vector<8x128xbf16>, vector<128x128xbf16>, vector<8x128xf32> -> vector<8x128xf32>
    %cst_80 = arith.constant 0.899999976 : f32
    %138 = vector.broadcast %cst_80 : f32 to vector<8x128xf32>
    %139 = arith.mulf %138, %132 : vector<8x128xf32>
    %140 = arith.addf %137, %11 : vector<8x128xf32>
    %141 = arith.addf %139, %140 : vector<8x128xf32>
    %142 = math.tanh %141 : vector<8x128xf32>
    %c104 = arith.constant 104 : index
    %c0_81 = arith.constant 0 : index
    %143 = vector.load %arg5[%c104, %c0_81] : memref<128x128xf32, #tpu.memory_space<vmem>>, vector<8x128xf32>
    tpu.vector_store %arg5[%c104, %c0_81], %142 {strides = array<i32>} : memref<128x128xf32, #tpu.memory_space<vmem>>, vector<8x128xf32>,
    %144 = arith.truncf %142 : vector<8x128xf32> to vector<8x128xbf16>
    %c0_82 = arith.constant 0 : index
    %c0_83 = arith.constant 0 : index
    %145 = vector.load %arg4[%c0_82, %c0_83] : memref<128x128xbf16, #tpu.memory_space<vmem>>, vector<128x128xbf16>
    %cst_84 = arith.constant dense<0.000000e+00> : vector<8x128xf32>
    %146 = tpu.matmul %144, %145, %cst_84 {dimension_numbers = #tpu.dot_dimension_numbers<[1], [0], [0], [1], [0, 0, 1, 1], [], []>} : vector<8x128xbf16>, vector<128x128xbf16>, vector<8x128xf32> -> vector<8x128xf32>
    %cst_85 = arith.constant 0.899999976 : f32
    %147 = vector.broadcast %cst_85 : f32 to vector<8x128xf32>
    %148 = arith.mulf %147, %141 : vector<8x128xf32>
    %149 = arith.addf %146, %11 : vector<8x128xf32>
    %150 = arith.addf %148, %149 : vector<8x128xf32>
    %151 = math.tanh %150 : vector<8x128xf32>
    %c112 = arith.constant 112 : index
    %c0_86 = arith.constant 0 : index
    %152 = vector.load %arg5[%c112, %c0_86] : memref<128x128xf32, #tpu.memory_space<vmem>>, vector<8x128xf32>
    tpu.vector_store %arg5[%c112, %c0_86], %151 {strides = array<i32>} : memref<128x128xf32, #tpu.memory_space<vmem>>, vector<8x128xf32>,
    %153 = arith.truncf %151 : vector<8x128xf32> to vector<8x128xbf16>
    %c0_87 = arith.constant 0 : index
    %c0_88 = arith.constant 0 : index
    %154 = vector.load %arg4[%c0_87, %c0_88] : memref<128x128xbf16, #tpu.memory_space<vmem>>, vector<128x128xbf16>
    %cst_89 = arith.constant dense<0.000000e+00> : vector<8x128xf32>
    %155 = tpu.matmul %153, %154, %cst_89 {dimension_numbers = #tpu.dot_dimension_numbers<[1], [0], [0], [1], [0, 0, 1, 1], [], []>} : vector<8x128xbf16>, vector<128x128xbf16>, vector<8x128xf32> -> vector<8x128xf32>
    %cst_90 = arith.constant 0.899999976 : f32
    %156 = vector.broadcast %cst_90 : f32 to vector<8x128xf32>
    %157 = arith.mulf %156, %150 : vector<8x128xf32>
    %158 = arith.addf %155, %11 : vector<8x128xf32>
    %159 = arith.addf %157, %158 : vector<8x128xf32>
    %160 = math.tanh %159 : vector<8x128xf32>
    %c120 = arith.constant 120 : index
    %c0_91 = arith.constant 0 : index
    %161 = vector.load %arg5[%c120, %c0_91] : memref<128x128xf32, #tpu.memory_space<vmem>>, vector<8x128xf32>
    tpu.vector_store %arg5[%c120, %c0_91], %160 {strides = array<i32>} : memref<128x128xf32, #tpu.memory_space<vmem>>, vector<8x128xf32>,
    %c0_92 = arith.constant 0 : index
    %c0_93 = arith.constant 0 : index
    %162 = vector.load %arg2[%c0_92, %c0_93] : memref<1x128xf32, #tpu.memory_space<vmem>>, vector<1x128xf32>
    %cst_94 = arith.constant 3.906250e-02 : f32
    %163 = vector.broadcast %cst_94 : f32 to vector<1x128xf32>
    %164 = arith.mulf %163, %162 : vector<1x128xf32>
    %c0_95 = arith.constant 0 : index
    %c0_96 = arith.constant 0 : index
    %165 = vector.load %arg2[%c0_95, %c0_96] : memref<1x128xf32, #tpu.memory_space<vmem>>, vector<1x128xf32>
    %166 = vector.shape_cast %165 : vector<1x128xf32> to vector<1x1x128xf32>
    %cst_97 = arith.constant dense<0.000000e+00> : vector<1xf32>
    %167 = vector.multi_reduction <add>, %166, %cst_97 [1, 2] : vector<1x1x128xf32> to vector<1xf32>
    %168 = vector.shape_cast %167 : vector<1xf32> to vector<1x1x1xf32>
    %169 = vector.extract %168[0, 0, 0] : f32 from vector<1x1x1xf32>
    %cst_98 = arith.constant 3.906250e-02 : f32
    %170 = arith.mulf %cst_98, %169 : f32
    %c0_99 = arith.constant 0 : index
    %c0_100 = arith.constant 0 : index
    %171 = vector.load %arg5[%c0_99, %c0_100] : memref<128x128xf32, #tpu.memory_space<vmem>>, vector<128x128xf32>
    %cst_101 = arith.constant dense<0.000000e+00> : vector<1x128xf32>
    %172 = tpu.matmul %164, %171, %cst_101 {dimension_numbers = #tpu.dot_dimension_numbers<[1], [1], [0], [0], [0, 0, 1, 0], [], []>} : vector<1x128xf32>, vector<128x128xf32>, vector<1x128xf32> -> vector<1x128xf32>
    %173 = vector.broadcast %170 : f32 to vector<1x128xf32>
    %174 = arith.addf %172, %173 : vector<1x128xf32>
    %c0_102 = arith.constant 0 : index
    %c0_103 = arith.constant 0 : index
    %175 = vector.load %arg3[%c0_102, %c0_103] : memref<1x128xf32, #tpu.memory_space<vmem>>, vector<1x128xf32>
    tpu.vector_store %arg3[%c0_102, %c0_103], %174 {strides = array<i32>} : memref<1x128xf32, #tpu.memory_space<vmem>>, vector<1x128xf32>,
    return
  }
}

</mosaic_0001>

<bundles_post_ra>
// kernel: tpu_custom_call.1
= control target key start
LH: loop header
LB: loop body
LE: loop exit
PB: predicated region body
PF: predicated region fallthrough
CT: control target
= control target key end

     0   :  { %8 = vsyncpa [#allocation5], 0  ;;  %s2479_s0 = inlined_call_operand.hbm [shape: f32[8,128], index: 0, kind: input, shape index: {}]   ;;  %s2480_s1 = inlined_call_operand.hbm [shape: f32[128,128], index: 1, kind: input, shape index: {}]   ;;  %s2481_s2 = inlined_call_operand.vmem [shape: f32[1,128], index: 2, kind: input, shape index: {}]   ;;  %s2482_s3 = inlined_call_operand.hbm [shape: f32[1,128], index: 3, kind: output, shape index: {}]  }
   0x1   :  { %9 = vsyncpa [#allocation8], 0 }
   0x2   :  { %10 = vsyncpa [#allocation6], 0  ;;  %s16_s14 = sshll.u32 %s2479_s0, 4  ;;  %s2336_s15 = smov [#allocation4]   ;;  %s17_s14 = int_to_ptr.hbm [resolvable:$true] %s16_s14 }
   0x3   :  { %s18_s16 = sshll.u32 %s2336_s15, 4  ;;  %s26_s19 = sshll.u32 %s2480_s1, 4  ;;  %s19_s16 = int_to_ptr.vmem [resolvable:$true] %s18_s16  ;;  %s27_s19 = int_to_ptr.hbm [resolvable:$true] %s26_s19 }
   0x4   :  { %21 = dma.hbm_to_vmem [thread:$0]  %s17_s14, 128, %s19_s16, [#allocation5]  }
   0x5   :  { %s2337_s20 = smov [#allocation7]   ;;  %s2338_s22 = smov 128  }
   0x6   :  { %s28_s21 = sshll.u32 %s2337_s20, 4  ;;  %s2339_s23 = smov 8   ;;  %s29_s21 = int_to_ptr.vmem [resolvable:$true] %s28_s21 }
   0x7   :  { %34 = dma.hbm_to_vmem [thread:$0]  %s27_s19, 2048, %s29_s21, [#allocation8], %s2338_s22, %s2338_s22, %s2339_s23  }
   0x8   :  { %2330 = dma.done.wait [#allocation5], 128  }
   0x9   :  { %2331 = vsyncadd [#allocation5], 4294967168 }
   0xa   :  { %2332 = dma.done.wait [#allocation8], 2048  }
   0xb   :  { %2333 = vsyncadd [#allocation8], 4294965248  ;;  %v2368_v0 = vld [vmem:[#allocation7 + $0x70] sm:$0xff]  ;;  %v2370_v1 = vld [vmem:[#allocation7 + $0x78] sm:$0xff]  ;;  %v2340_v59 = vmov 0   ;;  %vm1463_vm0 = vcmask 1040384  }
   0xc   :  { %v2372_v2 = vld [vmem:[#allocation7 + $0x60] sm:$0xff]  ;;  %v76_v3 = vmul.f32 0.05, %v2368_v0  ;;  %v77_v4 = vmul.f32 0.05, %v2370_v1  ;;  %v2376_v5 = vld [vmem:[#allocation7 + $0x68] sm:$0xff] }
   0xd   :  { %v2378_v6 = vld [vmem:[#allocation7 + $0x50] sm:$0xff]  ;;  %v74_v7 = vmul.f32 0.05, %v2372_v2  ;;  %v75_v8 = vmul.f32 0.05, %v2376_v5  ;;  %v2382_v9 = vld [vmem:[#allocation7 + $0x58] sm:$0xff] }
   0xe   :  { %v54_v10 = vld [vmem:[#allocation7 + $0x40] sm:$0xff]  ;;  %v2209_v11 = vpack.c.bf16 %v77_v4, %v76_v3  ;;  %v72_v12 = vmul.f32 0.05, %v2378_v6  ;;  %v73_v13 = vmul.f32 0.05, %v2382_v9  ;;  %v55_v14 = vld [vmem:[#allocation7 + $0x48] sm:$0xff] }
   0xf   :  { %v52_v15 = vld [vmem:[#allocation7 + $0x30] sm:$0xff]  ;;  %v2204_v16 = vpack.c.bf16 %v75_v8, %v74_v7  ;;  %v70_v17 = vmul.f32 0.05, %v54_v10  ;;  %v71_v18 = vmul.f32 0.05, %v55_v14  ;;  %v53_v19 = vld [vmem:[#allocation7 + $0x38] sm:$0xff] }
  0x10   :  { %v50_v20 = vld [vmem:[#allocation7 + $0x20] sm:$0xff]  ;;  %2217 = vst [vmem:[#allocation2 + $0x38] sm:$0xff] %v2209_v11   ;;  %v2199_v21 = vpack.c.bf16 %v73_v13, %v72_v12  ;;  %v68_v22 = vmul.f32 0.05, %v52_v15  ;;  %v69_v23 = vmul.f32 0.05, %v53_v19 }
  0x11   :  { %v51_v24 = vld [vmem:[#allocation7 + $0x28] sm:$0xff]  ;;  %2216 = vst [vmem:[#allocation2 + $0x28] sm:$0xff] %v2204_v16   ;;  %v2194_v25 = vpack.c.bf16 %v71_v18, %v70_v17  ;;  %v66_v26 = vmul.f32 0.05, %v50_v20  ;;  %v48_v28 = vld [vmem:[#allocation7 + $0x10] sm:$0xff]  ;;  %v49_v30 = vld [vmem:[#allocation7 + $0x18] sm:$0xff] }
  0x12   :  { %v67_v27 = vmul.f32 0.05, %v51_v24  ;;  %2215 = vst [vmem:[#allocation2 + $0x20] sm:$0xff] %v2199_v21   ;;  %v2189_v29 = vpack.c.bf16 %v69_v23, %v68_v22  ;;  %v64_v31 = vmul.f32 0.05, %v48_v28  ;;  %v46_v32 = vld [vmem:[#allocation7] sm:$0xff] }
  0x13   :  { %v47_v33 = vld [vmem:[#allocation7 + $0x8] sm:$0xff]  ;;  %2214 = vst [vmem:[#allocation2 + $0x8] sm:$0xff] %v2194_v25   ;;  %v65_v35 = vmul.f32 0.05, %v49_v30  ;;  %v62_v36 = vmul.f32 0.05, %v46_v32 }
  0x14   :  { %v2184_v34 = vpack.c.bf16 %v67_v27, %v66_v26  ;;  %2213 = vst [vmem:[#allocation2 + $0x10] sm:$0xff] %v2189_v29   ;;  %v63_v37 = vmul.f32 0.05, %v47_v33  ;;  %v126_v45 = vadd.f32 %v47_v33, %v46_v32  ;;  %v148_v18 = vld [vmem:[#allocation4] sm:$0xff]  ;;  %s2341_s25 = smov [#allocation9]   ;;  %s1520_s29 = sshll.u32 %s2482_s3, 4  ;;  %s1521_s29 = int_to_ptr.hbm [resolvable:$true] %s1520_s29 }
  0x15   :  { %v2179_v38 = vpack.c.bf16 %v65_v35, %v64_v31  ;;  %s1518_s26 = sshll.u32 %s2341_s25, 4  ;;  %s1519_s26 = int_to_ptr.vmem [resolvable:$true] %s1518_s26 }
  0x16   :  { %2212 = vst [vmem:[#allocation2 + $0x18] sm:$0xff] %v2184_v34   ;;  %v2174_v39 = vpack.c.bf16 %v63_v37, %v62_v36  ;;  %v127_v46 = vadd.f32 %v126_v45, %v48_v28 }
  0x17   :  { %v2050_v40 = vld [vmem:[#allocation2 + $0x38] sm:$0xff]  ;;  %2211 = vst [vmem:[#allocation2] sm:$0xff] %v2179_v38  }
  0x18   :  { %2175 = vst [vmem:[#allocation2 + $0x30] sm:$0xff] %v2174_v39   ;;  %215 = vmatpush.bf16.msra.mxu1 %v2050_v40  ;;  %v2049_v41 = vld [vmem:[#allocation2 + $0x28] sm:$0xff]  ;;  %v128_v48 = vadd.f32 %v127_v46, %v49_v30  ;;  %v2058_v54 = vld [vmem:[#allocation2 + $0x38] sm:$0xff] }
  0x19   :  { %v2048_v42 = vld [vmem:[#allocation2 + $0x20] sm:$0xff]  ;;  %v2057_v57 = vld [vmem:[#allocation2 + $0x28] sm:$0xff]  ;;  %v2074_v31 = vld [vmem:[#allocation2 + $0x38] sm:$0xff] }
  0x1a   :  { %v2047_v43 = vld [vmem:[#allocation2 + $0x8] sm:$0xff]  ;;  %v129_v49 = vadd.f32 %v128_v48, %v50_v20  ;;  %v2056_v61 = vld [vmem:[#allocation2 + $0x20] sm:$0xff]  ;;  %v149_v20 = vmul.f32 0.1, %v148_v18  ;;  %461 = vmatpush.bf16.msra.mxu3 %v2074_v31  ;;  %v2082_v46 = vld [vmem:[#allocation2 + $0x38] sm:$0xff] }
  0x1b   :  { %v2046_v44 = vld [vmem:[#allocation2 + $0x10] sm:$0xff]  ;;  %v2055_v3 = vld [vmem:[#allocation2 + $0x8] sm:$0xff]  ;;  %v2072_v33 = vld [vmem:[#allocation2 + $0x20] sm:$0xff]  ;;  %543 = vmatpush.bf16.msra.mxu0 %v2082_v46 }
  0x1c   :  { %216 = vmatpush.bf16.msra.mxu1 %v2049_v41  ;;  %v130_v51 = vadd.f32 %v129_v49, %v51_v24  ;;  %v2054_v8 = vld [vmem:[#allocation2 + $0x10] sm:$0xff]  ;;  %v2073_v32 = vld [vmem:[#allocation2 + $0x28] sm:$0xff]  ;;  %v2080_v48 = vld [vmem:[#allocation2 + $0x20] sm:$0xff] }
  0x1d   :  { %v2045_v47 = vld [vmem:[#allocation2 + $0x18] sm:$0xff]  ;;  %v2062_v21 = vld [vmem:[#allocation2 + $0x10] sm:$0xff]  ;;  %v2071_v34 = vld [vmem:[#allocation2 + $0x8] sm:$0xff] }
  0x1e   :  { %v2044_v50 = vld [vmem:[#allocation2] sm:$0xff]  ;;  %v131_v52 = vadd.f32 %v130_v51, %v52_v15  ;;  %v2053_v11 = vld [vmem:[#allocation2 + $0x18] sm:$0xff]  ;;  %462 = vmatpush.bf16.msra.mxu3 %v2073_v32  ;;  %v2070_v35 = vld [vmem:[#allocation2 + $0x10] sm:$0xff] }
  0x1f   :  { %v2043_v53 = vld [vmem:[#allocation2 + $0x30] sm:$0xff]  ;;  %v2061_v28 = vld [vmem:[#allocation2 + $0x18] sm:$0xff]  ;;  %v2060_v29 = vld [vmem:[#allocation2] sm:$0xff] }
  0x20   :  { %217 = vmatpush.bf16.msra.mxu1 %v2048_v42  ;;  %v132_v55 = vadd.f32 %v131_v52, %v53_v19  ;;  %v2059_v30 = vld [vmem:[#allocation2 + $0x30] sm:$0xff]  ;;  %v2079_v49 = vld [vmem:[#allocation2 + $0x8] sm:$0xff]  ;;  %v2104_v31 = vld [vmem:[#allocation2 + $0x20] sm:$0xff] }
  0x21   :  { %v2067_v45 = vld [vmem:[#allocation2 + $0x30] sm:$0xff]  ;;  %v2103_v32 = vld [vmem:[#allocation2 + $0x8] sm:$0xff] }
  0x22   :  { %v133_v56 = vadd.f32 %v132_v55, %v54_v10  ;;  %463 = vmatpush.bf16.msra.mxu3 %v2072_v33  ;;  %v2102_v33 = vld [vmem:[#allocation2 + $0x10] sm:$0xff]  ;;  %v2113_v46 = vld [vmem:[#allocation2 + $0x28] sm:$0xff] }
  0x24   :  { %218 = vmatpush.bf16.msra.mxu1 %v2047_v43  ;;  %v134_v58 = vadd.f32 %v133_v56, %v55_v14  ;;  %v2069_v43 = vld [vmem:[#allocation2 + $0x18] sm:$0xff] }
  0x26   :  { %v135_v60 = vadd.f32 %v134_v58, %v2378_v6  ;;  %v2052_v6 = vld [vmem:[#allocation2] sm:$0xff]  ;;  %464 = vmatpush.bf16.msra.mxu3 %v2071_v34  ;;  %v2077_v58 = vld [vmem:[#allocation2 + $0x18] sm:$0xff] }
  0x28   :  { %219 = vmatpush.bf16.msra.mxu1 %v2046_v44  ;;  %v136_v62 = vadd.f32 %v135_v60, %v2382_v9  ;;  %v2051_v9 = vld [vmem:[#allocation2 + $0x30] sm:$0xff]  ;;  %v2068_v44 = vld [vmem:[#allocation2] sm:$0xff] }
  0x29   :  { %v2075_v60 = vld [vmem:[#allocation2 + $0x30] sm:$0xff] }
  0x2a   :  { %v137_v63 = vadd.f32 %v136_v62, %v2372_v2  ;;  %v2066_v2 = vld [vmem:[#allocation2 + $0x38] sm:$0xff]  ;;  %465 = vmatpush.bf16.msra.mxu3 %v2070_v35  ;;  %v2089_v62 = vld [vmem:[#allocation2 + $0x28] sm:$0xff] }
  0x2b   :  { %379 = vmatpush.bf16.msra.mxu2 %v2066_v2  ;;  %v2083_v2 = vld [vmem:[#allocation2 + $0x30] sm:$0xff] }
  0x2c   :  { %220 = vmatpush.bf16.msra.mxu1 %v2045_v47  ;;  %v138_v4 = vadd.f32 %v137_v63, %v2376_v5  ;;  %v2065_v5 = vld [vmem:[#allocation2 + $0x28] sm:$0xff]  ;;  %v2088_v63 = vld [vmem:[#allocation2 + $0x20] sm:$0xff] }
  0x2d   :  { %v2081_v47 = vld [vmem:[#allocation2 + $0x28] sm:$0xff] }
  0x2e   :  { %v139_v7 = vadd.f32 %v138_v4, %v2368_v0  ;;  %v2064_v0 = vld [vmem:[#allocation2 + $0x20] sm:$0xff]  ;;  %466 = vmatpush.bf16.msra.mxu3 %v2069_v43  ;;  %544 = vmatpush.bf16.msra.mxu0 %v2081_v47  ;;  %v2086_v4 = vld [vmem:[#allocation2 + $0x10] sm:$0xff] }
  0x2f   :  { %380 = vmatpush.bf16.msra.mxu2 %v2065_v5  ;;  %v2097_v5 = vld [vmem:[#allocation2 + $0x28] sm:$0xff]  ;;  %v2100_v43 = vld [vmem:[#allocation2] sm:$0xff] }
  0x30   :  { %221 = vmatpush.bf16.msra.mxu1 %v2044_v50  ;;  %v140_v10 = vadd.f32 %v139_v7, %v2370_v1  ;;  %v2063_v1 = vld [vmem:[#allocation2 + $0x8] sm:$0xff]  ;;  %v2078_v50 = vld [vmem:[#allocation2 + $0x10] sm:$0xff]  ;;  %v2112_v47 = vld [vmem:[#allocation2 + $0x20] sm:$0xff] }
  0x32   :  { %v141_v12 = vrot.slane %v140_v10, 4  ;;  %467 = vmatpush.bf16.msra.mxu3 %v2068_v44  ;;  %545 = vmatpush.bf16.msra.mxu0 %v2080_v48  ;;  %v2099_v44 = vld [vmem:[#allocation2 + $0x30] sm:$0xff]  ;;  %v2111_v48 = vld [vmem:[#allocation2 + $0x8] sm:$0xff] }
  0x33   :  { %381 = vmatpush.bf16.msra.mxu2 %v2064_v0  ;;  %v2095_v0 = vld [vmem:[#allocation2 + $0x8] sm:$0xff] }
  0x34   :  { %222 = vmatpush.bf16.msra.mxu1 %v2043_v53  ;;  %v142_v13 = vadd.f32 %v141_v12, %v140_v10 }
  0x36   :  { %v143_v14 = vrot.slane %v142_v13, 2  ;;  %468 = vmatpush.bf16.msra.mxu3 %v2067_v45  ;;  %546 = vmatpush.bf16.msra.mxu0 %v2079_v49  ;;  %v2114_v45 = vld [vmem:[#allocation2 + $0x38] sm:$0xff]  ;;  %v2110_v49 = vld [vmem:[#allocation2 + $0x10] sm:$0xff] }
  0x37   :  { %223 = vmatmul.bf16.vlgmr.msra.gmra.mxu1 %v2340_v59  ;;  %382 = vmatpush.bf16.msra.mxu2 %v2063_v1  ;;  %v2076_v59 = vld [vmem:[#allocation2] sm:$0xff] }
  0x38   :  { %297 = vmatpush.bf16.msrb.mxu1 %v2058_v54  ;;  %v144_v15 = vadd.f32 %v143_v14, %v142_v13  ;;  %v2084_v14 = vld [vmem:[#allocation2] sm:$0xff] }
  0x3a   :  { %v145_v16 = vrot.slane %v144_v15, 1  ;;  %547 = vmatpush.bf16.msra.mxu0 %v2078_v50 }
  0x3b   :  { %383 = vmatpush.bf16.msra.mxu2 %v2062_v21 }
  0x3c   :  { %298 = vmatpush.bf16.msrb.mxu1 %v2057_v57  ;;  %v146_v17 = vadd.f32 %v145_v16, %v144_v15  ;;  %v2098_v15 = vld [vmem:[#allocation2 + $0x38] sm:$0xff]  ;;  %v2096_v16 = vld [vmem:[#allocation2 + $0x20] sm:$0xff] }
  0x3e   :  { %v2392_v19 = vmul.f32 0.05, %v146_v17  ;;  %548 = vmatpush.bf16.msra.mxu0 %v2077_v58  ;;  %v2094_v17 = vld [vmem:[#allocation2 + $0x10] sm:$0xff]  ;;  %v2109_v58 = vld [vmem:[#allocation2 + $0x18] sm:$0xff] }
  0x3f   :  { %384 = vmatpush.bf16.msra.mxu2 %v2061_v28  ;;  %v2091_v28 = vld [vmem:[#allocation2 + $0x30] sm:$0xff] }
  0x40   :  { %299 = vmatpush.bf16.msrb.mxu1 %v2056_v61  ;;  %v2395_v22 = vadd.f32 %v149_v20, %v2392_v19  ;;  %v2090_v61 = vld [vmem:[#allocation2 + $0x38] sm:$0xff] }
  0x42   :  { %549 = vmatpush.bf16.msra.mxu0 %v2076_v59  ;;  %v2108_v59 = vld [vmem:[#allocation2] sm:$0xff] }
  0x43   :  { %385 = vmatpush.bf16.msra.mxu2 %v2060_v29  ;;  %v2106_v29 = vld [vmem:[#allocation2 + $0x38] sm:$0xff] }
  0x44   :  { %300 = vmatpush.bf16.msrb.mxu1 %v2055_v3  ;;  %v2087_v3 = vld [vmem:[#allocation2 + $0x8] sm:$0xff]  ;;  %789 = vmatpush.bf16.msrb.mxu3 %v2106_v29  ;;  %v2124_v29 = vld [vmem:[#allocation2] sm:$0xff] }
  0x46   :  { %550 = vmatpush.bf16.msra.mxu0 %v2075_v60  ;;  %v2107_v60 = vld [vmem:[#allocation2 + $0x30] sm:$0xff] }
  0x47   :  { %386 = vmatpush.bf16.msra.mxu2 %v2059_v30  ;;  %v2105_v30 = vld [vmem:[#allocation2 + $0x28] sm:$0xff] }
  0x48   :  { %301 = vmatpush.bf16.msrb.mxu1 %v2054_v8  ;;  %790 = vmatpush.bf16.msrb.mxu3 %v2105_v30  ;;  %v2123_v30 = vld [vmem:[#allocation2 + $0x30] sm:$0xff] }
  0x4a   :  { %871 = vmatpush.bf16.msrb.mxu0 %v2114_v45  ;;  %v2133_v45 = vld [vmem:[#allocation2 + $0x18] sm:$0xff] }
  0x4b   :  { %707 = vmatpush.bf16.msrb.mxu2 %v2098_v15  ;;  %v2115_v15 = vld [vmem:[#allocation2 + $0x30] sm:$0xff] }
  0x4c   :  { %302 = vmatpush.bf16.msrb.mxu1 %v2053_v11  ;;  %791 = vmatpush.bf16.msrb.mxu3 %v2104_v31  ;;  %v2138_v31 = vld [vmem:[#allocation2 + $0x38] sm:$0xff] }
  0x4e   :  { %872 = vmatpush.bf16.msrb.mxu0 %v2113_v46  ;;  %v2132_v46 = vld [vmem:[#allocation2] sm:$0xff] }
  0x4f   :  { %708 = vmatpush.bf16.msrb.mxu2 %v2097_v5  ;;  %v2130_v5 = vld [vmem:[#allocation2 + $0x38] sm:$0xff] }
  0x50   :  { %303 = vmatpush.bf16.msrb.mxu1 %v2052_v6  ;;  %792 = vmatpush.bf16.msrb.mxu3 %v2103_v32  ;;  %v2137_v32 = vld [vmem:[#allocation2 + $0x28] sm:$0xff] }
  0x52   :  { %873 = vmatpush.bf16.msrb.mxu0 %v2112_v47  ;;  %v2131_v47 = vld [vmem:[#allocation2 + $0x30] sm:$0xff] }
  0x53   :  { %709 = vmatpush.bf16.msrb.mxu2 %v2096_v16  ;;  %v2129_v16 = vld [vmem:[#allocation2 + $0x28] sm:$0xff] }
  0x54   :  { %304 = vmatpush.bf16.msrb.mxu1 %v2051_v9  ;;  %v2085_v9 = vld [vmem:[#allocation2 + $0x18] sm:$0xff]  ;;  %793 = vmatpush.bf16.msrb.mxu3 %v2102_v33  ;;  %v2136_v33 = vld [vmem:[#allocation2 + $0x20] sm:$0xff] }
  0x56   :  { %874 = vmatpush.bf16.msrb.mxu0 %v2111_v48  ;;  %v2146_v48 = vld [vmem:[#allocation2 + $0x38] sm:$0xff] }
  0x57   :  { %710 = vmatpush.bf16.msrb.mxu2 %v2095_v0  ;;  %v2128_v0 = vld [vmem:[#allocation2 + $0x20] sm:$0xff] }
  0x58   :  { %625 = vmatpush.bf16.msra.mxu1 %v2090_v61  ;;  %v2122_v61 = vld [vmem:[#allocation2 + $0x38] sm:$0xff] }
  0x5a   :  { %875 = vmatpush.bf16.msrb.mxu0 %v2110_v49  ;;  %v2145_v49 = vld [vmem:[#allocation2 + $0x28] sm:$0xff] }
  0x5b   :  { %711 = vmatpush.bf16.msrb.mxu2 %v2094_v17  ;;  %v2127_v17 = vld [vmem:[#allocation2 + $0x8] sm:$0xff] }
  0x5c   :  { %626 = vmatpush.bf16.msra.mxu1 %v2089_v62  ;;  %v2121_v62 = vld [vmem:[#allocation2 + $0x28] sm:$0xff] }
  0x5e   :  { %876 = vmatpush.bf16.msrb.mxu0 %v2109_v58 }
  0x60   :  { %627 = vmatpush.bf16.msra.mxu1 %v2088_v63  ;;  %v2120_v63 = vld [vmem:[#allocation2 + $0x20] sm:$0xff] }
  0x62   :  { %877 = vmatpush.bf16.msrb.mxu0 %v2108_v59 }
  0x64   :  { %628 = vmatpush.bf16.msra.mxu1 %v2087_v3  ;;  %v2119_v3 = vld [vmem:[#allocation2 + $0x8] sm:$0xff] }
  0x66   :  { %878 = vmatpush.bf16.msrb.mxu0 %v2107_v60 }
  0x68   :  { %629 = vmatpush.bf16.msra.mxu1 %v2086_v4  ;;  %v2118_v4 = vld [vmem:[#allocation2 + $0x10] sm:$0xff] }
  0x6c   :  { %630 = vmatpush.bf16.msra.mxu1 %v2085_v9 }
  0x70   :  { %631 = vmatpush.bf16.msra.mxu1 %v2084_v14  ;;  %v2117_v14 = vld [vmem:[#allocation2 + $0x18] sm:$0xff] }
  0x74   :  { %632 = vmatpush.bf16.msra.mxu1 %v2083_v2  ;;  %v2116_v2 = vld [vmem:[#allocation2] sm:$0xff] }
  0xb4   :  { %v224_v23 = vpop.f32.mrf.mxu1 }
  0xb5   :  { %v225_v24 = vadd.f32 %v224_v23, %v2395_v22 }
  0xb7   :  { %2226 = vtanh.f32 %v225_v24  ;;  %v248_v37 = vmul.f32 0.9, %v225_v24 }
  0xbc   :  { %v226_v25 = vpop.f32.mrf.mxu1 }
  0xbd   :  { %v2398_v26 = vpop.eup %2226  ;;  %v2093_v25 = vld [vmem:[#allocation2 + $0x18] sm:$0xff] }
  0xbe   :  { %v231_v27 = vpack.c.bf16 %v2398_v26, %v2398_v26  ;;  %712 = vmatpush.bf16.msrb.mxu2 %v2093_v25 }
  0xc0   :  { %305 = vmatmul.bf16.vlgmr.msrb.gmra.mxu1 %v231_v27  ;;  %v2092_v27 = vld [vmem:[#allocation2] sm:$0xff] }
  0xc1   :  { %953 = vmatpush.bf16.msrb.mxu1 %v2122_v61 }
  0xc2   :  { %713 = vmatpush.bf16.msrb.mxu2 %v2092_v27 }
  0xc5   :  { %954 = vmatpush.bf16.msrb.mxu1 %v2121_v62  ;;  %v2141_v62 = vld [vmem:[#allocation2 + $0x18] sm:$0xff] }
  0xc6   :  { %714 = vmatpush.bf16.msrb.mxu2 %v2091_v28  ;;  %v2125_v28 = vld [vmem:[#allocation2 + $0x18] sm:$0xff] }
  0xc9   :  { %955 = vmatpush.bf16.msrb.mxu1 %v2120_v63  ;;  %v2140_v63 = vld [vmem:[#allocation2] sm:$0xff] }
  0xcd   :  { %956 = vmatpush.bf16.msrb.mxu1 %v2119_v3  ;;  %v2139_v3 = vld [vmem:[#allocation2 + $0x30] sm:$0xff] }
  0xd1   :  { %957 = vmatpush.bf16.msrb.mxu1 %v2118_v4  ;;  %v2154_v4 = vld [vmem:[#allocation2 + $0x38] sm:$0xff] }
  0xd5   :  { %958 = vmatpush.bf16.msrb.mxu1 %v2117_v14 }
  0xd9   :  { %959 = vmatpush.bf16.msrb.mxu1 %v2116_v2 }
  0xdd   :  { %960 = vmatpush.bf16.msrb.mxu1 %v2115_v15 }
 0x13d   :  { %v306_v36 = vpop.f32.mrf.mxu1 }
 0x13e   :  { %v307_v38 = vadd.f32 %v306_v36, %v2395_v22 }
 0x140   :  { %v310_v39 = vadd.f32 %v307_v38, %v248_v37 }
 0x142   :  { %2228 = vtanh.f32 %v310_v39  ;;  %v330_v52 = vmul.f32 0.9, %v310_v39 }
 0x145   :  { %v308_v40 = vpop.f32.mrf.mxu1 }
 0x148   :  { %v2403_v41 = vpop.eup %2228 }
 0x149   :  { %v313_v42 = vpack.c.bf16 %v2403_v41, %v2403_v41 }
 0x14b   :  { %387 = vmatmul.bf16.vlgmr.msra.gmra.mxu2 %v313_v42  ;;  %v2101_v42 = vld [vmem:[#allocation2 + $0x18] sm:$0xff] }
 0x14c   :  { %794 = vmatpush.bf16.msrb.mxu3 %v2101_v42  ;;  %1035 = vmatpush.bf16.msra.mxu2 %v2130_v5 }
 0x150   :  { %795 = vmatpush.bf16.msrb.mxu3 %v2100_v43  ;;  %1036 = vmatpush.bf16.msra.mxu2 %v2129_v16 }
 0x154   :  { %796 = vmatpush.bf16.msrb.mxu3 %v2099_v44  ;;  %1037 = vmatpush.bf16.msra.mxu2 %v2128_v0  ;;  %v2149_v0 = vld [vmem:[#allocation2 + $0x18] sm:$0xff] }
 0x158   :  { %1038 = vmatpush.bf16.msra.mxu2 %v2127_v17  ;;  %v2148_v17 = vld [vmem:[#allocation2] sm:$0xff] }
 0x1ce   :  { %v388_v51 = vpop.f32.mrf.mxu2 }
 0x1cf   :  { %v389_v53 = vadd.f32 %v388_v51, %v2395_v22 }
 0x1d1   :  { %v392_v54 = vadd.f32 %v389_v53, %v330_v52 }
 0x1d3   :  { %2230 = vtanh.f32 %v392_v54  ;;  %v412_v8 = vmul.f32 0.9, %v392_v54 }
 0x1d6   :  { %v390_v55 = vpop.f32.mrf.mxu2 }
 0x1d9   :  { %v2408_v56 = vpop.eup %2230 }
 0x1da   :  { %v395_v57 = vpack.c.bf16 %v2408_v56, %v2408_v56 }
 0x1dc   :  { %469 = vmatmul.bf16.vlgmr.msra.gmra.mxu3 %v395_v57 }
 0x1dd   :  { %1117 = vmatpush.bf16.msra.mxu3 %v2138_v31 }
 0x1e1   :  { %1118 = vmatpush.bf16.msra.mxu3 %v2137_v32 }
 0x1e5   :  { %1119 = vmatpush.bf16.msra.mxu3 %v2136_v33 }
 0x25f   :  { %v470_v7 = vpop.f32.mrf.mxu3 }
 0x260   :  { %v471_v10 = vadd.f32 %v470_v7, %v2395_v22 }
 0x262   :  { %v474_v11 = vadd.f32 %v471_v10, %v412_v8 }
 0x264   :  { %2232 = vtanh.f32 %v474_v11  ;;  %v494_v1 = vmul.f32 0.9, %v474_v11 }
 0x267   :  { %v472_v12 = vpop.f32.mrf.mxu3 }
 0x26a   :  { %v2413_v6 = vpop.eup %2232 }
 0x26b   :  { %v477_v13 = vpack.c.bf16 %v2413_v6, %v2413_v6 }
 0x26d   :  { %551 = vmatmul.bf16.vlgmr.msra.gmra.mxu0 %v477_v13 }
 0x26e   :  { %1199 = vmatpush.bf16.msra.mxu0 %v2146_v48 }
 0x272   :  { %1200 = vmatpush.bf16.msra.mxu0 %v2145_v49 }
 0x2ea   :  { %v552_v18 = vpop.f32.mrf.mxu0 }
 0x2eb   :  { %v553_v20 = vadd.f32 %v552_v18, %v2392_v19  ;;  %v2126_v18 = vld [vmem:[#allocation2 + $0x10] sm:$0xff] }
 0x2ec   :  { %1039 = vmatpush.bf16.msra.mxu2 %v2126_v18  ;;  %v2147_v18 = vld [vmem:[#allocation2 + $0x30] sm:$0xff] }
 0x2ed   :  { %v556_v21 = vadd.f32 %v553_v20, %v494_v1 }
 0x2ef   :  { %2234 = vtanh.f32 %v556_v21  ;;  %v576_v35 = vmul.f32 0.9, %v556_v21 }
 0x2f0   :  { %1040 = vmatpush.bf16.msra.mxu2 %v2125_v28 }
 0x2f2   :  { %v554_v22 = vpop.f32.mrf.mxu0 }
 0x2f4   :  { %1041 = vmatpush.bf16.msra.mxu2 %v2124_v29 }
 0x2f5   :  { %v2418_v23 = vpop.eup %2234 }
 0x2f6   :  { %v559_v24 = vpack.c.bf16 %v2418_v23, %v2418_v23 }
 0x2f8   :  { %633 = vmatmul.bf16.vlgmr.msra.gmra.mxu1 %v559_v24  ;;  %1042 = vmatpush.bf16.msra.mxu2 %v2123_v30 }
 0x2f9   :  { %1281 = vmatpush.bf16.msra.mxu1 %v2154_v4  ;;  %v1461_v4 = vld [vmem:[%s2481_s2] sm:$0x1] }
 0x375   :  { %v634_v34 = vpop.f32.mrf.mxu1 }
 0x376   :  { %v635_v36 = vadd.f32 %v634_v34, %v2392_v19  ;;  %v2135_v34 = vld [vmem:[#allocation2 + $0x8] sm:$0xff] }
 0x377   :  { %1120 = vmatpush.bf16.msra.mxu3 %v2135_v34  ;;  %v2157_v34 = vld [vmem:[#allocation2 + $0x18] sm:$0xff] }
 0x378   :  { %v638_v37 = vadd.f32 %v635_v36, %v576_v35  ;;  %v2134_v35 = vld [vmem:[#allocation2 + $0x10] sm:$0xff] }
 0x37a   :  { %2236 = vtanh.f32 %v638_v37  ;;  %v658_v51 = vmul.f32 0.9, %v638_v37 }
 0x37b   :  { %1121 = vmatpush.bf16.msra.mxu3 %v2134_v35  ;;  %v2156_v35 = vld [vmem:[#allocation2] sm:$0xff] }
 0x37d   :  { %v636_v38 = vpop.f32.mrf.mxu1 }
 0x37f   :  { %1122 = vmatpush.bf16.msra.mxu3 %v2133_v45 }
 0x380   :  { %v2423_v39 = vpop.eup %2236 }
 0x381   :  { %v641_v40 = vpack.c.bf16 %v2423_v39, %v2423_v39 }
 0x383   :  { %715 = vmatmul.bf16.vlgmr.msrb.gmra.mxu2 %v641_v40  ;;  %1123 = vmatpush.bf16.msra.mxu3 %v2132_v46 }
 0x387   :  { %1124 = vmatpush.bf16.msra.mxu3 %v2131_v47 }
 0x406   :  { %v716_v50 = vpop.f32.mrf.mxu2 }
 0x407   :  { %v717_v52 = vadd.f32 %v716_v50, %v2392_v19  ;;  %v2144_v50 = vld [vmem:[#allocation2 + $0x20] sm:$0xff] }
 0x408   :  { %1201 = vmatpush.bf16.msra.mxu0 %v2144_v50 }
 0x409   :  { %v720_v53 = vadd.f32 %v717_v52, %v658_v51  ;;  %v2143_v51 = vld [vmem:[#allocation2 + $0x8] sm:$0xff]  ;;  %v2142_v52 = vld [vmem:[#allocation2 + $0x10] sm:$0xff] }
 0x40b   :  { %2238 = vtanh.f32 %v720_v53  ;;  %v740_v8 = vmul.f32 0.9, %v720_v53 }
 0x40c   :  { %1202 = vmatpush.bf16.msra.mxu0 %v2143_v51 }
 0x40e   :  { %v718_v54 = vpop.f32.mrf.mxu2 }
 0x410   :  { %1203 = vmatpush.bf16.msra.mxu0 %v2142_v52  ;;  %v2165_v52 = vld [vmem:[#allocation2 + $0x18] sm:$0xff] }
 0x411   :  { %v2428_v55 = vpop.eup %2238 }
 0x412   :  { %v723_v57 = vpack.c.bf16 %v2428_v55, %v2428_v55 }
 0x414   :  { %797 = vmatmul.bf16.vlgmr.msrb.gmra.mxu3 %v723_v57  ;;  %1204 = vmatpush.bf16.msra.mxu0 %v2141_v62 }
 0x418   :  { %1205 = vmatpush.bf16.msra.mxu0 %v2140_v63 }
 0x41c   :  { %1206 = vmatpush.bf16.msra.mxu0 %v2139_v3 }
 0x497   :  { %v798_v7 = vpop.f32.mrf.mxu3 }
 0x498   :  { %v799_v10 = vadd.f32 %v798_v7, %v2392_v19  ;;  %v2153_v7 = vld [vmem:[#allocation2 + $0x28] sm:$0xff] }
 0x499   :  { %1282 = vmatpush.bf16.msra.mxu1 %v2153_v7  ;;  %v1464_v7 = vsel %vm1463_vm0, %v1461_v4, 0.0 }
 0x49a   :  { %v802_v11 = vadd.f32 %v799_v10, %v740_v8  ;;  %v2152_v8 = vld [vmem:[#allocation2 + $0x20] sm:$0xff]  ;;  %v2151_v10 = vld [vmem:[#allocation2 + $0x8] sm:$0xff]  ;;  %1465 = vadd.xlane.f32.xlu0 %v1464_v7 }
 0x49c   :  { %2240 = vtanh.f32 %v802_v11  ;;  %v822_v20 = vmul.f32 0.9, %v802_v11  ;;  %v2150_v11 = vld [vmem:[#allocation2 + $0x10] sm:$0xff] }
 0x49d   :  { %1283 = vmatpush.bf16.msra.mxu1 %v2152_v8 }
 0x49f   :  { %v800_v12 = vpop.f32.mrf.mxu3 }
 0x4a1   :  { %1284 = vmatpush.bf16.msra.mxu1 %v2151_v10 }
 0x4a2   :  { %v2433_v13 = vpop.eup %2240 }
 0x4a3   :  { %v805_v9 = vpack.c.bf16 %v2433_v13, %v2433_v13 }
 0x4a5   :  { %879 = vmatmul.bf16.vlgmr.msrb.gmra.mxu0 %v805_v9  ;;  %1285 = vmatpush.bf16.msra.mxu1 %v2150_v11 }
 0x4a9   :  { %1286 = vmatpush.bf16.msra.mxu1 %v2149_v0 }
 0x4ad   :  { %1287 = vmatpush.bf16.msra.mxu1 %v2148_v17 }
 0x4b1   :  { %1288 = vmatpush.bf16.msra.mxu1 %v2147_v18 }
 0x522   :  { %v880_v1 = vpop.f32.mrf.mxu0 }
 0x523   :  { %v881_v21 = vadd.f32 %v880_v1, %v2392_v19  ;;  %v2162_v1 = vld [vmem:[#allocation2 + $0x38] sm:$0xff] }
 0x524   :  { %1363 = vmatpush.bf16.msrb.mxu2 %v2162_v1 }
 0x525   :  { %v884_v22 = vadd.f32 %v881_v21, %v822_v20  ;;  %v2161_v20 = vld [vmem:[#allocation2 + $0x28] sm:$0xff]  ;;  %v2160_v21 = vld [vmem:[#allocation2 + $0x20] sm:$0xff] }
 0x527   :  { %2242 = vtanh.f32 %v884_v22  ;;  %v904_v37 = vmul.f32 0.9, %v884_v22  ;;  %v2159_v22 = vld [vmem:[#allocation2 + $0x8] sm:$0xff] }
 0x528   :  { %1364 = vmatpush.bf16.msrb.mxu2 %v2161_v20 }
 0x52a   :  { %v882_v24 = vpop.f32.mrf.mxu0 }
 0x52b   :  { %v2158_v24 = vld [vmem:[#allocation2 + $0x10] sm:$0xff] }
 0x52c   :  { %1365 = vmatpush.bf16.msrb.mxu2 %v2160_v21 }
 0x52d   :  { %v2438_v25 = vpop.eup %2242 }
 0x52e   :  { %v887_v27 = vpack.c.bf16 %v2438_v25, %v2438_v25 }
 0x530   :  { %961 = vmatmul.bf16.vlgmr.msrb.gmra.mxu1 %v887_v27  ;;  %1366 = vmatpush.bf16.msrb.mxu2 %v2159_v22 }
 0x534   :  { %1367 = vmatpush.bf16.msrb.mxu2 %v2158_v24 }
 0x538   :  { %1368 = vmatpush.bf16.msrb.mxu2 %v2157_v34 }
 0x53c   :  { %1369 = vmatpush.bf16.msrb.mxu2 %v2156_v35 }
 0x5ad   :  { %v962_v36 = vpop.f32.mrf.mxu1 }
 0x5ae   :  { %v963_v38 = vadd.f32 %v962_v36, %v2392_v19  ;;  %v2155_v36 = vld [vmem:[#allocation2 + $0x30] sm:$0xff] }
 0x5af   :  { %1370 = vmatpush.bf16.msrb.mxu2 %v2155_v36 }
 0x5b0   :  { %v966_v40 = vadd.f32 %v963_v38, %v904_v37  ;;  %v2170_v37 = vld [vmem:[#allocation2 + $0x38] sm:$0xff]  ;;  %v2169_v38 = vld [vmem:[#allocation2 + $0x28] sm:$0xff] }
 0x5b1   :  { %1445 = vmatpush.bf16.msrb.mxu3 %v2170_v37 }
 0x5b2   :  { %2244 = vtanh.f32 %v966_v40  ;;  %v986_v54 = vmul.f32 0.9, %v966_v40  ;;  %v2168_v40 = vld [vmem:[#allocation2 + $0x20] sm:$0xff] }
 0x5b5   :  { %v964_v42 = vpop.f32.mrf.mxu1  ;;  %1446 = vmatpush.bf16.msrb.mxu3 %v2169_v38 }
 0x5b6   :  { %v2167_v42 = vld [vmem:[#allocation2 + $0x8] sm:$0xff] }
 0x5b8   :  { %v2443_v43 = vpop.eup %2244 }
 0x5b9   :  { %v969_v44 = vpack.c.bf16 %v2443_v43, %v2443_v43  ;;  %1447 = vmatpush.bf16.msrb.mxu3 %v2168_v40 }
 0x5bb   :  { %1043 = vmatmul.bf16.vlgmr.msra.gmra.mxu2 %v969_v44  ;;  %v2166_v44 = vld [vmem:[#allocation2 + $0x10] sm:$0xff] }
 0x5bd   :  { %1448 = vmatpush.bf16.msrb.mxu3 %v2167_v42 }
 0x5c1   :  { %1449 = vmatpush.bf16.msrb.mxu3 %v2166_v44 }
 0x5c5   :  { %1450 = vmatpush.bf16.msrb.mxu3 %v2165_v52 }
 0x63e   :  { %v1044_v53 = vpop.f32.mrf.mxu2 }
 0x63f   :  { %v1045_v57 = vadd.f32 %v1044_v53, %v2392_v19  ;;  %v2164_v53 = vld [vmem:[#allocation2] sm:$0xff] }
 0x640   :  { %1451 = vmatpush.bf16.msrb.mxu3 %v2164_v53 }
 0x641   :  { %v1048_v58 = vadd.f32 %v1045_v57, %v986_v54  ;;  %v2163_v54 = vld [vmem:[#allocation2 + $0x30] sm:$0xff] }
 0x643   :  { %2246 = vtanh.f32 %v1048_v58  ;;  %v1068_v9 = vmul.f32 0.9, %v1048_v58 }
 0x644   :  { %1452 = vmatpush.bf16.msrb.mxu3 %v2163_v54 }
 0x646   :  { %v1046_v59 = vpop.f32.mrf.mxu2 }
 0x649   :  { %v2448_v60 = vpop.eup %2246 }
 0x64a   :  { %v1051_v61 = vpack.c.bf16 %v2448_v60, %v2448_v60 }
 0x64c   :  { %1125 = vmatmul.bf16.vlgmr.msra.gmra.mxu3 %v1051_v61 }
 0x6cf   :  { %v1126_v12 = vpop.f32.mrf.mxu3 }
 0x6d0   :  { %v1127_v14 = vadd.f32 %v1126_v12, %v2392_v19 }
 0x6d2   :  { %v1130_v2 = vadd.f32 %v1127_v14, %v1068_v9 }
 0x6d4   :  { %2248 = vtanh.f32 %v1130_v2  ;;  %v1150_v28 = vmul.f32 0.9, %v1130_v2 }
 0x6d7   :  { %v1128_v15 = vpop.f32.mrf.mxu3 }
 0x6da   :  { %v2453_v5 = vpop.eup %2248 }
 0x6db   :  { %v1133_v16 = vpack.c.bf16 %v2453_v5, %v2453_v5 }
 0x6dd   :  { %1207 = vmatmul.bf16.vlgmr.msra.gmra.mxu0 %v1133_v16 }
 0x75a   :  { %v1208_v27 = vpop.f32.mrf.mxu0 }
 0x75b   :  { %v1209_v29 = vadd.f32 %v1208_v27, %v2392_v19 }
 0x75d   :  { %v1212_v30 = vadd.f32 %v1209_v29, %v1150_v28 }
 0x75f   :  { %2250 = vtanh.f32 %v1212_v30  ;;  %v1232_v46 = vmul.f32 0.9, %v1212_v30 }
 0x762   :  { %v1210_v31 = vpop.f32.mrf.mxu0 }
 0x765   :  { %v2251_v32 = vpop.eup %2250 }
 0x766   :  { %v1215_v33 = vpack.c.bf16 %v2251_v32, %v2251_v32 }
 0x768   :  { %1289 = vmatmul.bf16.vlgmr.msra.gmra.mxu1 %v1215_v33 }
 0x7e5   :  { %v1290_v45 = vpop.f32.mrf.mxu1 }
 0x7e6   :  { %v1291_v47 = vadd.f32 %v1290_v45, %v2392_v19 }
 0x7e8   :  { %v1294_v48 = vadd.f32 %v1291_v47, %v1232_v46 }
 0x7ea   :  { %2252 = vtanh.f32 %v1294_v48  ;;  %v1314_v58 = vmul.f32 0.9, %v1294_v48 }
 0x7ed   :  { %v1292_v49 = vpop.f32.mrf.mxu1 }
 0x7f0   :  { %v2253_v50 = vpop.eup %2252 }
 0x7f1   :  { %v1297_v51 = vpack.c.bf16 %v2253_v50, %v2253_v50 }
 0x7f3   :  { %1371 = vmatmul.bf16.vlgmr.msrb.gmra.mxu2 %v1297_v51 }
 0x876   :  { %v1372_v57 = vpop.f32.mrf.mxu2 }
 0x877   :  { %v1373_v59 = vadd.f32 %v1372_v57, %v2392_v19 }
 0x879   :  { %v1376_v61 = vadd.f32 %v1373_v59, %v1314_v58 }
 0x87b   :  { %2254 = vtanh.f32 %v1376_v61  ;;  %v1396_v10 = vmul.f32 0.9, %v1376_v61 }
 0x87e   :  { %v1374_v62 = vpop.f32.mrf.mxu2 }
 0x881   :  { %v2255_v63 = vpop.eup %2254 }
 0x882   :  { %v1379_v3 = vpack.c.bf16 %v2255_v63, %v2255_v63 }
 0x884   :  { %1453 = vmatmul.bf16.vlgmr.msrb.gmra.mxu3 %v1379_v3 }
 0x907   :  { %v1454_v8 = vpop.f32.mrf.mxu3 }
 0x908   :  { %v1455_v11 = vadd.f32 %v1454_v8, %v2392_v19  ;;  %v1462_v19 = vmul.f32 0.0390625, %v1461_v4 }
 0x90a   :  { %v1458_v12 = vadd.f32 %v1455_v11, %v1396_v10 }
 0x90c   :  { %2256 = vtanh.f32 %v1458_v12 }
 0x90f   :  { %v1456_v9 = vpop.f32.mrf.mxu3 }
 0x912   :  { %v2257_v14 = vpop.eup %2256 }
 0x913   :  { %1492 = vmatpush.xpose.msrb.mxu0 %v2257_v14 }
 0x917   :  { %1493 = vmatpush.xpose.msrb.mxu0 %v2255_v63 }
 0x91b   :  { %1494 = vmatpush.xpose.msrb.mxu0 %v2253_v50 }
 0x91f   :  { %1495 = vmatpush.xpose.msrb.mxu0 %v2251_v32 }
 0x923   :  { %1496 = vmatpush.xpose.msrb.mxu0 %v2453_v5 }
 0x927   :  { %1497 = vmatpush.xpose.msrb.mxu0 %v2448_v60 }
 0x92b   :  { %1498 = vmatpush.xpose.msrb.mxu0 %v2443_v43  ;;  %v1466_v43 = vpop.xlane.xlu0 %1465 }
 0x92f   :  { %1499 = vmatpush.xpose.msrb.mxu0 %v2438_v25  ;;  %v1467_v25 = vrot.slane %v1466_v43, 4 }
 0x931   :  { %v1468_v60 = vadd.f32 %v1467_v25, %v1466_v43 }
 0x933   :  { %1500 = vmatpush.xpose.msrb.mxu0 %v2433_v13  ;;  %v1469_v13 = vrot.slane %v1468_v60, 2 }
 0x935   :  { %v1470_v2 = vadd.f32 %v1469_v13, %v1468_v60 }
 0x937   :  { %1501 = vmatpush.xpose.msrb.mxu0 %v2428_v55  ;;  %v1471_v55 = vrot.slane %v1470_v2, 1 }
 0x939   :  { %v1472_v15 = vadd.f32 %v1471_v55, %v1470_v2 }
 0x93b   :  { %1502 = vmatpush.xpose.msrb.mxu0 %v2423_v39  ;;  %2218 = vpush %v1472_v15 }
 0x93f   :  { %1503 = vmatpush.xpose.msrb.mxu0 %v2418_v23 }
 0x943   :  { %1504 = vmatpush.xpose.msrb.mxu0 %v2413_v6 }
 0x947   :  { %1505 = vmatpush.xpose.msrb.mxu0 %v2408_v56 }
 0x94b   :  { %1506 = vmatpush.xpose.msrb.mxu0 %v2403_v41 }
 0x94f   :  { %1507 = vmatpush.xpose.msrb.mxu0 %v2398_v26 }
 0x952   :  { %1508 = vmatmul.f32.vlgmr.msrb.gmra.mxu0 %v1462_v19 }
 0x96c   :  { %s2219_s2 = spop %2218 }
 0x96d   :  { %s1474_s24 = smul.f32 0.0390625, %s2219_s2 }
 0x96f   :  { %v1491_v41 = vstv %s1474_s24 }
 0x9cf   :  { %v1509_v56 = vpop.f32.mrf.mxu0 }
 0x9d0   :  { %v1510_v26 = vadd.f32 %v1509_v56, %v1491_v41 }
 0x9d2   :  { %1512 = vst [vmem:[#allocation9] sm:$0x1] %v1510_v26 }
 0x9d3   :  { %1523 = dma.vmem_to_hbm [thread:$0]  %s1519_s26, 16, %s1521_s29, [#allocation6]  }
 0x9d4   :  { %2334 = dma.done.wait [#allocation6], 16  }
 0x9d5   :  { %2335 = vsyncadd [#allocation6], 4294967280 }
 0x9d6   :  { %1528 = vsyncpa [#allocation5], 1 }
 0x9d7   :  { %1529 = vsyncpa [#allocation8], 1 }
 0x9d8   :  { %1530 = vsyncpa [#allocation6], 1 }

</bundles_post_ra>
